<compile_context>
chip_gen: v6e
topology: v6e:2x2x1
jax: 0.10.0
libtpu: 0.0.40
codegen_flags: <defaults>
</compile_context>

<pallas_src>
import jax
import jax.numpy as jnp
from jax.experimental import pallas as pl
from jax.experimental.pallas import tpu as pltpu


def _round_up(x, m):
    return (x + m - 1) // m * m


def span_head_kernel(x_ref, w1_ref, b1_ref, wh_ref, bh_ref, out_ref):
    # x_ref: (row_tile, H) f32 tile of the flattened encoder output.
    # Cast to bf16 in VMEM (VPU cast) -> no extra HBM pass in the wrapper.
    x = x_ref[...].astype(jnp.bfloat16)

    # mid_linear: Linear(H -> M) + ReLU (Dropout = identity at inference).
    # MXU accumulates in f32; bias add + ReLU stay on the f32 accumulator.
    h = jnp.dot(x, w1_ref[...], preferred_element_type=jnp.float32)
    h = jnp.maximum(h + b1_ref[...], 0.0)

    # Fused start_fc + end_fc (lane-padded to 128 columns): one MXU pass.
    h = h.astype(wh_ref.dtype)
    logits = jnp.dot(h, wh_ref[...], preferred_element_type=jnp.float32) + bh_ref[...]

    out_ref[...] = logits.astype(out_ref.dtype)


def prepare_span_head_params(w_mid, b_mid, w_start, b_start, w_end, b_end,
                             *, lane_pad=128):
    """One-time weight prep (hoisted out of the per-call forward).

    Weights are stored [in, out] so the kernel does plain x @ W (PyTorch
    nn.Linear stores [out, in] and does x @ W.T — mathematically identical).
    start/end heads are fused along the output axis and zero-padded to a
    multiple of 128 lanes for lane-dense stores."""
    M = w_mid.shape[1]
    T = w_start.shape[1]
    T2 = 2 * T
    T2_pad = _round_up(max(T2, lane_pad), lane_pad)

    w_head = jnp.concatenate([w_start, w_end], axis=1)          # [M, 2T]
    b_head = jnp.concatenate([b_start, b_end], axis=0)          # [2T]
    if T2_pad != T2:
        w_head = jnp.pad(w_head, ((0, 0), (0, T2_pad - T2)))
        b_head = jnp.pad(b_head, ((0, T2_pad - T2),))

    return {
        "w_mid": w_mid.astype(jnp.bfloat16),                    # [H, M] bf16
        "b_mid": b_mid.reshape(1, M).astype(jnp.float32),        # [1, M] f32
        "w_head": w_head.astype(jnp.bfloat16),                   # [M, T2_pad] bf16
        "b_head": b_head.reshape(1, T2_pad).astype(jnp.float32), # [1, T2_pad] f32
        "num_tags": T,
    }


def span_model_forward(seq_out, params, *, row_tile=1024):
    """seq_out: [B, S, H] f32 -> (start_logits [B,S,T], end_logits [B,S,T])."""
    B, S, H = seq_out.shape
    w_mid, b_mid = params["w_mid"], params["b_mid"]
    w_head, b_head = params["w_head"], params["b_head"]
    T = params["num_tags"]
    M = w_mid.shape[1]
    T2_pad = w_head.shape[1]

    rows = B * S
    # Sublane-aligned tile, never bigger than the (rounded-up) row count.
    row_tile = max(8, min(row_tile, _round_up(rows, 8)))
    # Guarantee >= 2 grid steps when possible so v7x megacore gets both TCs.
    if rows > 8 and pl.cdiv(rows, row_tile) < 2:
        row_tile = max(8, _round_up(pl.cdiv(rows, 2), 8))
    grid = (pl.cdiv(rows, row_tile),)

    # Flatten only (contiguous reshape); NO pad, NO dtype cast in the wrapper.
    x2d = seq_out.reshape(rows, H)
    # NOTE: H should be 128-aligned for the real deployed model (BERT hidden
    # 768/1024 is); the demo H=32 merely underfills lanes/MXU K.

    full = lambda shape: pl.BlockSpec(shape, lambda i: (0, 0))

    cost = pl.CostEstimate(
        flops=2 * rows * (H * M + M * T2_pad),
        transcendentals=0,
        bytes_accessed=(rows * H * seq_out.dtype.itemsize   # x (f32, streamed once)
                        + (H * M + M * T2_pad) * 2          # weights (bf16, resident)
                        + (M + T2_pad) * 4                  # biases (f32)
                        + rows * T2_pad * 4),               # padded fused logits (f32)
    )

    fused = pl.pallas_call(
        span_head_kernel,
        out_shape=jax.ShapeDtypeStruct((rows, T2_pad), jnp.float32),
        grid_spec=pltpu.PrefetchScalarGridSpec(
            num_scalar_prefetch=0,
            grid=grid,
            in_specs=[
                pl.BlockSpec((row_tile, H), lambda i: (i, 0)),  # x tile (f32)
                full((H, M)),                                    # W_mid (bf16, resident)
                full((1, M)),                                    # b_mid (f32)
                full((M, T2_pad)),                               # fused head W (bf16)
                full((1, T2_pad)),                               # fused head b (f32)
            ],
            out_specs=pl.BlockSpec((row_tile, T2_pad), lambda i: (i, 0)),
        ),
        compiler_params=pltpu.CompilerParams(
            dimension_semantics=("parallel",),
            # Unlocks large row tiles on v5e (16 MiB scoped default); actual
            # usage stays far below v7x's 64 MiB physical VMEM for head shapes.
            vmem_limit_bytes=64 << 20,
        ),
        cost_estimate=cost,
    )(x2d, w_mid, b_mid, w_head, b_head)

    start_logits = fused[:, :T].reshape(B, S, T)
    end_logits = fused[:, T:2 * T].reshape(B, S, T)
    return start_logits, end_logits


def init_params(key, hidden_size, mid_dims, num_tags):
    """Deterministic synthetic init matching SpanModel.__init__ shapes.

    Weights ~ N(0, 0.02); biases zero (as in BaseModel._init_weights)."""
    k1, k2, k3 = jax.random.split(key, 3)
    std = 0.02
    w_mid = (jax.random.normal(k1, (hidden_size, mid_dims)) * std).astype(jnp.float32)
    b_mid = jnp.zeros((mid_dims,), jnp.float32)
    w_start = (jax.random.normal(k2, (mid_dims, num_tags)) * std).astype(jnp.float32)
    b_start = jnp.zeros((num_tags,), jnp.float32)
    w_end = (jax.random.normal(k3, (mid_dims, num_tags)) * std).astype(jnp.float32)
    b_end = jnp.zeros((num_tags,), jnp.float32)
    return w_mid, b_mid, w_start, b_start, w_end, b_end


if __name__ == "__main__":
    # Small shapes consistent with the module's forward:
    #   batch=2, seq=64, bert hidden=32 (synthetic), mid_linear_dims=128, num_tags=8
    B, S, H = 2, 64, 32
    MID, NUM_TAGS = 128, 8

    key = jax.random.PRNGKey(0)
    k_x, k_p = jax.random.split(key)

    # seq_out stands in for bert_outputs[0]
    seq_out = jax.random.normal(k_x, (B, S, H), dtype=jnp.float32)
    raw_params = init_params(k_p, H, MID, NUM_TAGS)

    # One-time weight prep (fused / lane-padded / bf16), reused across calls.
    params = prepare_span_head_params(*raw_params)

    start_logits, end_logits = span_model_forward(seq_out, params)
    jax.block_until_ready((start_logits, end_logits))

    # Reference check in plain JAX with the same bf16-matmul / f32-accumulate math
    # (matches the PyTorch forward in eval mode up to the bf16 operand cast).
    w_mid, b_mid, w_start, b_start, w_end, b_end = raw_params
    x_bf = seq_out.reshape(-1, H).astype(jnp.bfloat16)
    h_ref = jnp.maximum(
        jnp.dot(x_bf, w_mid.astype(jnp.bfloat16),
                preferred_element_type=jnp.float32) + b_mid, 0.0)
    h_bf = h_ref.astype(jnp.bfloat16)
    s_ref = (jnp.dot(h_bf, w_start.astype(jnp.bfloat16),
                     preferred_element_type=jnp.float32) + b_start).reshape(B, S, NUM_TAGS)
    e_ref = (jnp.dot(h_bf, w_end.astype(jnp.bfloat16),
                     preferred_element_type=jnp.float32) + b_end).reshape(B, S, NUM_TAGS)
    assert jnp.allclose(start_logits, s_ref, atol=1e-4, rtol=1e-3)
    assert jnp.allclose(end_logits, e_ref, atol=1e-4, rtol=1e-3)

    # Sanity vs. full-f32 reference (benign bf16-level logit differences).
    h_f32 = jnp.maximum(seq_out.reshape(-1, H) @ w_mid + b_mid, 0.0)
    s_f32 = (h_f32 @ w_start + b_start).reshape(B, S, NUM_TAGS)
    e_f32 = (h_f32 @ w_end + b_end).reshape(B, S, NUM_TAGS)
    assert jnp.allclose(start_logits, s_f32, atol=5e-3, rtol=5e-2)
    assert jnp.allclose(end_logits, e_f32, atol=5e-3, rtol=5e-2)

    assert start_logits.shape == (B, S, NUM_TAGS)
    assert end_logits.shape == (B, S, NUM_TAGS)

    print("KERNEL_OK")
</pallas_src>

<mosaic_0001>
module attributes {stable_mosaic.version = 11 : i64} {
  func.func @span_head_kernel(%arg0: i32, %arg1: memref<64x32xf32, #tpu.memory_space<vmem>>, %arg2: memref<32x128xbf16, #tpu.memory_space<vmem>>, %arg3: memref<1x128xf32, #tpu.memory_space<vmem>>, %arg4: memref<128x128xbf16, #tpu.memory_space<vmem>>, %arg5: memref<1x128xf32, #tpu.memory_space<vmem>>, %arg6: memref<64x128xf32, #tpu.memory_space<vmem>>) attributes {dimension_semantics = [#tpu.dimension_semantics<parallel>], iteration_bounds = array<i64: 2>, scalar_prefetch = 0 : i64, scratch_operands = 0 : i64, tpu.core_type = #tpu.core_type<tc>, window_params = [{transform_indices = @transform_0, window_bounds = array<i64: 64, 32>}, {pipeline_mode = #tpu.pipeline_mode<synchronous>, transform_indices = @transform_1, window_bounds = array<i64: 32, 128>}, {pipeline_mode = #tpu.pipeline_mode<synchronous>, transform_indices = @transform_2, window_bounds = array<i64: 1, 128>}, {pipeline_mode = #tpu.pipeline_mode<synchronous>, transform_indices = @transform_3, window_bounds = array<i64: 128, 128>}, {pipeline_mode = #tpu.pipeline_mode<synchronous>, transform_indices = @transform_4, window_bounds = array<i64: 1, 128>}, {transform_indices = @transform_5, window_bounds = array<i64: 64, 128>}]} {
    %c0 = arith.constant 0 : index
    %c0_0 = arith.constant 0 : index
    %0 = vector.load %arg1[%c0, %c0_0] : memref<64x32xf32, #tpu.memory_space<vmem>>, vector<64x32xf32>
    %1 = arith.truncf %0 : vector<64x32xf32> to vector<64x32xbf16>
    %c0_1 = arith.constant 0 : index
    %c0_2 = arith.constant 0 : index
    %2 = vector.load %arg2[%c0_1, %c0_2] : memref<32x128xbf16, #tpu.memory_space<vmem>>, vector<32x128xbf16>
    %cst = arith.constant dense<0.000000e+00> : vector<64x128xf32>
    %3 = tpu.matmul %1, %2, %cst {dimension_numbers = #tpu.dot_dimension_numbers<[1], [0], [0], [1], [0, 0, 1, 1], [], []>} : vector<64x32xbf16>, vector<32x128xbf16>, vector<64x128xf32> -> vector<64x128xf32>
    %c0_3 = arith.constant 0 : index
    %c0_4 = arith.constant 0 : index
    %4 = vector.load %arg3[%c0_3, %c0_4] : memref<1x128xf32, #tpu.memory_space<vmem>>, vector<1x128xf32>
    %5 = vector.broadcast %4 : vector<1x128xf32> to vector<64x128xf32>
    %6 = arith.addf %3, %5 : vector<64x128xf32>
    %cst_5 = arith.constant 0.000000e+00 : f32
    %7 = vector.broadcast %cst_5 : f32 to vector<64x128xf32>
    %8 = arith.maximumf %6, %7 : vector<64x128xf32>
    %9 = arith.truncf %8 : vector<64x128xf32> to vector<64x128xbf16>
    %c0_6 = arith.constant 0 : index
    %c0_7 = arith.constant 0 : index
    %10 = vector.load %arg4[%c0_6, %c0_7] : memref<128x128xbf16, #tpu.memory_space<vmem>>, vector<128x128xbf16>
    %cst_8 = arith.constant dense<0.000000e+00> : vector<64x128xf32>
    %11 = tpu.matmul %9, %10, %cst_8 {dimension_numbers = #tpu.dot_dimension_numbers<[1], [0], [0], [1], [0, 0, 1, 1], [], []>} : vector<64x128xbf16>, vector<128x128xbf16>, vector<64x128xf32> -> vector<64x128xf32>
    %c0_9 = arith.constant 0 : index
    %c0_10 = arith.constant 0 : index
    %12 = vector.load %arg5[%c0_9, %c0_10] : memref<1x128xf32, #tpu.memory_space<vmem>>, vector<1x128xf32>
    %13 = vector.broadcast %12 : vector<1x128xf32> to vector<64x128xf32>
    %14 = arith.addf %11, %13 : vector<64x128xf32>
    %c0_11 = arith.constant 0 : index
    %c0_12 = arith.constant 0 : index
    %15 = vector.load %arg6[%c0_11, %c0_12] : memref<64x128xf32, #tpu.memory_space<vmem>>, vector<64x128xf32>
    tpu.vector_store %arg6[%c0_11, %c0_12], %14 {strides = array<i32>} : memref<64x128xf32, #tpu.memory_space<vmem>>, vector<64x128xf32>,
    return
  }
  func.func @transform_0(%arg0: i32) -> (i32, i32) {
    %c0_i32 = arith.constant 0 : i32
    %c0_i32_0 = arith.constant 0 : i32
    return %arg0, %c0_i32 : i32, i32
  }
  func.func @transform_1(%arg0: i32) -> (i32, i32) {
    %c0_i32 = arith.constant 0 : i32
    %c0_i32_0 = arith.constant 0 : i32
    %c0_i32_1 = arith.constant 0 : i32
    return %c0_i32, %c0_i32_0 : i32, i32
  }
  func.func @transform_2(%arg0: i32) -> (i32, i32) {
    %c0_i32 = arith.constant 0 : i32
    %c0_i32_0 = arith.constant 0 : i32
    %c0_i32_1 = arith.constant 0 : i32
    return %c0_i32, %c0_i32_0 : i32, i32
  }
  func.func @transform_3(%arg0: i32) -> (i32, i32) {
    %c0_i32 = arith.constant 0 : i32
    %c0_i32_0 = arith.constant 0 : i32
    %c0_i32_1 = arith.constant 0 : i32
    return %c0_i32, %c0_i32_0 : i32, i32
  }
  func.func @transform_4(%arg0: i32) -> (i32, i32) {
    %c0_i32 = arith.constant 0 : i32
    %c0_i32_0 = arith.constant 0 : i32
    %c0_i32_1 = arith.constant 0 : i32
    return %c0_i32, %c0_i32_0 : i32, i32
  }
  func.func @transform_5(%arg0: i32) -> (i32, i32) {
    %c0_i32 = arith.constant 0 : i32
    %c0_i32_0 = arith.constant 0 : i32
    return %arg0, %c0_i32 : i32, i32
  }
}

</mosaic_0001>

<bundles_post_ra>
// kernel: tpu_custom_call.1
= control target key start
LH: loop header
LB: loop body
LE: loop exit
PB: predicated region body
PF: predicated region fallthrough
CT: control target
= control target key end

     0   :  { %10 = vsyncpa [#allocation3], 0  ;;  %s946_s0 = inlined_call_operand.vmem [shape: f32[128,32], index: 0, kind: input, shape index: {}]   ;;  %s947_s1 = inlined_call_operand.vmem [shape: bf16[32,128], index: 1, kind: input, shape index: {}]   ;;  %s948_s2 = inlined_call_operand.vmem [shape: f32[1,128], index: 2, kind: input, shape index: {}]   ;;  %s949_s3 = inlined_call_operand.vmem [shape: bf16[128,128], index: 3, kind: input, shape index: {}]   ;;  %s950_s4 = inlined_call_operand.vmem [shape: f32[1,128], index: 4, kind: input, shape index: {}]   ;;  %s951_s5 = inlined_call_operand.hbm [shape: f32[128,128], index: 5, kind: output, shape index: {}]  }
   0x1   :  { %12 = vsyncpa [#allocation3 + $0x1], 0  ;;  %s801_s18 = smov 0   ;;  %s803_s19 = smov 0  }
   0x2   :  { %s805_s20 = smov 0   ;;  %s807_s21 = smov 0  }
   0x3 LB: > { %s822_s22 = sadd.s32 4294967295, %s766_s21   ;;  %s572_s23 = sadd.s32 4294967294, %s766_s21   ;;  %s766_s21 = sphi %s807_s21, %s957_s21   ;;  %s762_s20 = sphi %s805_s20, %s956_s20   ;;  %s758_s19 = sphi %s803_s19, %s955_s19   ;;  %s754_s18 = sphi %s801_s18, %s954_s18  }
   0x4   : > { %s826_s24 = sadd.s32 1, %s766_s21   ;;  %s135_s25 = sadd.s32 1, %s762_s20 }
   0x5   : > { %s132_s26 = ssub.s32 %s766_s21, %s826_s24  ;;  %p145_p0 = scmp.ne.s32.totalorder %s762_s20, %s758_s19 }
   0x6   : > { %p133_p1 = scmp.eq.s32.totalorder %s132_s26, 0  ;;  %p146_p2 = scmp.eq.s32.totalorder %s822_s22, 1 }
   0x7   : > { %p151_p3 = scmp.ne.s32.totalorder %s758_s19, %s754_s18  ;;  %p152_p4 = scmp.eq.s32.totalorder %s572_s23, 1 }
   0x8   : > { %s837_s27 = scalar_select %p133_p1, %s762_s20, %s135_s25  }
   0x9   : > { %p839_p5 = por %p146_p2, %p145_p0  ;;  %p843_p6 = por %p152_p4, %p151_p3 }
   0xa   : > { %p575_p7 = scmp.ge.s32.totalorder %s766_s21, 1  ;;  %p191_p8 = scmp.lt.s32.totalorder %s766_s21, 3 }
   0xc   : > { %p192_p9 = pnand %p575_p7, %p191_p8 }
   0xd   : > { %s577_s7 = sshll.u32 (!%p192_p9), %s822_s22, 3  ;;  %s216_s16 = sand.u32 (!%p192_p9), 1, %s758_s19  }
   0xe   : > { %195 = sbr.rel (%p192_p9) target bundleno = 457 (0x1c9), region = 40  ;;  %p220_p10 = scmp.lt.s32.totalorder (!%p192_p9), %s577_s7, 15 }
   0xf   : > { %s600_s30 = sshll.u32 (!%p192_p9), %s822_s22, 10  ;;  %s906_s22 = scalar_lea.sflag (!%p192_p9), [#allocation3], %s216_s16 }
  0x10   : > { %s900_s9 = scalar_lea.hbm (!%p192_p9), %s951_s5, %s600_s30  ;;  %s768_s11 = smov (!%p192_p9), [#allocation2]  }
  0x11   : > { %s710_s12 = sshll.u32 (!%p192_p9), %s768_s11, 4  ;;  %s711_s12 = int_to_ptr.vmem [resolvable:$false] %s710_s12 }
  0x12   : > { %s712_s13 = scalar_lea.vmem (!%p192_p9), %s711_s12, 2048 }
  0x13   : > { %v696_v0 = vld [vmem:[%s947_s1 + $0x8] sm:$0xff]   ;;  %v697_v1 = vld [vmem:[%s947_s1] sm:$0xff]   ;;  %v698_v2 = vld [vmem:[%s949_s3 + $0x38] sm:$0xff]   ;;  %s959_s7 = smov (!%p220_p10, %s577_s7), 15  ;;  %vm262_vm0 = vcmask 261120  }
  0x14   : > { %619 = vmatprep.subr.bf16.mxu0 %v696_v0  ;;  %v699_v3 = vld [vmem:[%s949_s3 + $0x30] sm:$0xff]   ;;  %631 = vmatprep.subr.bf16.mxu1 %v698_v2  ;;  %s578_s14 = sshll.u32 %s959_s7, 3  ;;  %v700_v4 = vld [vmem:[%s949_s3 + $0x28] sm:$0xff]   ;;  %v701_v14 = vld [vmem:[%s949_s3 + $0x20] sm:$0xff]  }
  0x15   : > { %620 = vmatpush3.bf16.msra.mxu0 %v696_v0  ;;  %632 = vmatpush3.bf16.msra.mxu1 %v698_v2  ;;  %s223_s17 = scalar_lea.vmem %s946_s0, %s578_s14  ;;  %v702_v17 = vld [vmem:[%s949_s3 + $0x18] sm:$0xff]   ;;  %v703_v19 = vld [vmem:[%s949_s3 + $0x10] sm:$0xff]   ;;  %v704_v20 = vld [vmem:[%s949_s3 + $0x8] sm:$0xff]  }
  0x16   : > { %621 = vmatprep.subr.bf16.mxu0 %v697_v1  ;;  %633 = vmatprep.subr.bf16.mxu1 %v699_v3  ;;  %v227_v5 = vld [vmem:[%s223_s17] sm:$0xff]  ;;  %v228_v6 = vld [vmem:[%s223_s17 + $0x8] sm:$0xff]  ;;  %v229_v7 = vld [vmem:[%s223_s17 + $0x10] sm:$0xff] }
  0x17   : > { %v235_v8 = vpack.c.bf16 %v228_v6, %v227_v5  ;;  %v230_v9 = vld [vmem:[%s223_s17 + $0x18] sm:$0xff]  ;;  %v231_v10 = vld [vmem:[%s223_s17 + $0x20] sm:$0xff]  ;;  %v232_v11 = vld [vmem:[%s223_s17 + $0x28] sm:$0xff] }
  0x18   : > { %v236_v12 = vpack.c.bf16 %v230_v9, %v229_v7  ;;  %v237_v13 = vpack.c.bf16 %v232_v11, %v231_v10  ;;  %v233_v15 = vld [vmem:[%s223_s17 + $0x30] sm:$0xff]  ;;  %v234_v16 = vld [vmem:[%s223_s17 + $0x38] sm:$0xff]  ;;  %v705_v21 = vld [vmem:[%s949_s3] sm:$0xff]   ;;  %s576_s17 = sshll.u32 %s216_s16, 6 }
  0x19   : > { %622 = vmatpush3.bf16.msra.mxu0 %v697_v1  ;;  %634 = vmatpush3.bf16.msra.mxu1 %v699_v3  ;;  %v238_v18 = vpack.c.bf16 %v234_v16, %v233_v15  ;;  %v579_v24 = vld [vmem:[%s948_s2] ss:$0 sm:$0xff]  ;;  %s218_s26 = scalar_lea.vmem [#allocation2], %s576_s17 }
  0x1a   : > { %623 = vmatprep.mubr.msk.bf16.mxu0 %vm262_vm0, %v235_v8  ;;  %635 = vmatprep.subr.bf16.mxu1 %v700_v4  ;;  %v586_v51 = vld [vmem:[%s950_s4] ss:$0 sm:$0xff]  ;;  %s510_s6 = sshll.u32 %s218_s26, 4  ;;  %s902_s6 = int_to_ptr.vmem [resolvable:$true] %s510_s6 }
  0x1b   : > { %s706_s10 = scalar_lea.vmem %s902_s6, 1024  ;;  %p713_p0 = scmp.lt.s32.totalorder %s902_s6, %s711_s12 }
  0x1c   : > { %624 = vmatmul.mubr.msk.bf16.vlgmr.msra.gmra.mxu0 %vm262_vm0, %v236_v12  ;;  %p707_p11 = scmp.ne.s32.totalorder %s902_s6, %s706_s10  ;;  %p714_p1 = scmp.lt.s32.totalorder %s712_s13, %s706_s10 }
  0x1d   : > { %627 = vmatprep.mubr.msk.bf16.mxu0 %vm262_vm0, %v237_v13  ;;  %636 = vmatpush3.bf16.msra.mxu1 %v700_v4 }
  0x1e   : > { %637 = vmatprep.subr.bf16.mxu1 %v701_v14  ;;  %p708_p12 = pnand %p707_p11, %p839_p5  ;;  %p715_p2 = por %p714_p1, %p713_p0 }
  0x20   : > { %p709_p13 = pneg %p708_p12 }
  0x21   : > { %638 = vmatpush3.bf16.msra.mxu1 %v701_v14 }
  0x22   : > { %639 = vmatprep.subr.bf16.mxu1 %v702_v17  ;;  %p716_p3 = pnand %p715_p2, %p709_p13 }
  0x24   : > { %628 = vmatmul.mubr.msk.bf16.gmra.mxu0 %vm262_vm0, %v238_v18 }
  0x25   : > { %640 = vmatpush3.bf16.msra.mxu1 %v702_v17 }
  0x26   : > { %641 = vmatprep.subr.bf16.mxu1 %v703_v19 }
  0x29   : > { %642 = vmatpush3.bf16.msra.mxu1 %v703_v19 }
  0x2a   : > { %643 = vmatprep.subr.bf16.mxu1 %v704_v20 }
  0x2d   : > { %644 = vmatpush3.bf16.msra.mxu1 %v704_v20 }
  0x2e   : > { %645 = vmatprep.subr.bf16.mxu1 %v705_v21 }
  0x31   : > { %646 = vmatpush3.bf16.msra.mxu1 %v705_v21 }
  0xdc   : > { %v625_v22 = vpop.f32.mrf.mxu0 }
  0xdd   : > { %v318_v28 = vadd.f32 %v625_v22, %v579_v24 }
  0xde   : > { %v309_v23 = vpop.f32.mrf.mxu0 }
  0xdf   : > { %v310_v26 = vadd.f32 %v579_v24, %v309_v23  ;;  %v342_v35 = vmax.f32 %v318_v28, 0.0 }
  0xe0   : > { %v626_v25 = vpop.f32.mrf.mxu0 }
  0xe1   : > { %v321_v27 = vadd.f32 %v626_v25, %v579_v24  ;;  %v340_v33 = vmax.f32 %v310_v26, 0.0 }
  0xe2   : > { %v312_v29 = vpop.f32.mrf.mxu0 }
  0xe3   : > { %v313_v30 = vadd.f32 %v579_v24, %v312_v29  ;;  %v343_v31 = vmax.f32 %v321_v27, 0.0 }
  0xe4   : > { %v629_v32 = vpop.f32.mrf.mxu0 }
  0xe5   : > { %v341_v34 = vmax.f32 %v313_v30, 0.0  ;;  %v349_v38 = vpack.c.bf16 %v343_v31, %v342_v35  ;;  %v334_v42 = vadd.f32 %v629_v32, %v579_v24 }
  0xe6   : > { %v325_v36 = vpop.f32.mrf.mxu0 }
  0xe7   : > { %v348_v37 = vpack.c.bf16 %v341_v34, %v340_v33  ;;  %v326_v40 = vadd.f32 %v579_v24, %v325_v36  ;;  %v346_v48 = vmax.f32 %v334_v42, 0.0 }
  0xe8   : > { %v630_v39 = vpop.f32.mrf.mxu0 }
  0xe9   : > { %v337_v41 = vadd.f32 %v630_v39, %v579_v24  ;;  %647 = vmatprep.mubr.bf16.mxu1 %v348_v37  ;;  %v344_v46 = vmax.f32 %v326_v40, 0.0 }
  0xea   : > { %v328_v43 = vpop.f32.mrf.mxu0  ;;  %648 = vmatmul.mubr.bf16.vlgmr.msra.gmra.mxu1 %v349_v38 }
  0xeb   : > { %v329_v44 = vadd.f32 %v579_v24, %v328_v43  ;;  %v347_v45 = vmax.f32 %v337_v41, 0.0 }
  0xed   : > { %v345_v47 = vmax.f32 %v329_v44, 0.0  ;;  %v351_v50 = vpack.c.bf16 %v347_v45, %v346_v48 }
  0xef   : > { %v350_v49 = vpack.c.bf16 %v345_v47, %v344_v46 }
  0xf1   : > { %651 = vmatprep.mubr.bf16.mxu1 %v350_v49 }
  0xf2   : > { %652 = vmatmul.mubr.bf16.gmra.mxu1 %v351_v50 }
 0x1aa   : > { %v649_v52 = vpop.f32.mrf.mxu1 }
 0x1ab   : > { %v466_v53 = vadd.f32 %v649_v52, %v586_v51 }
 0x1ac   : > { %v457_v54 = vpop.f32.mrf.mxu1 }
 0x1ad   : > { %490 = vst [vmem:[%s218_s26 + $0x10] sm:$0xff] %v466_v53  ;;  %v458_v55 = vadd.f32 %v586_v51, %v457_v54 }
 0x1ae   : > { %v650_v56 = vpop.f32.mrf.mxu1 }
 0x1af   : > { %488 = vst [vmem:[%s218_s26] sm:$0xff] %v458_v55  ;;  %v469_v57 = vadd.f32 %v650_v56, %v586_v51 }
 0x1b0   : > { %v460_v58 = vpop.f32.mrf.mxu1 }
 0x1b1   : > { %491 = vst [vmem:[%s218_s26 + $0x18] sm:$0xff] %v469_v57  ;;  %v461_v59 = vadd.f32 %v586_v51, %v460_v58 }
 0x1b2   : > { %v653_v60 = vpop.f32.mrf.mxu1 }
 0x1b3   : > { %489 = vst [vmem:[%s218_s26 + $0x8] sm:$0xff] %v461_v59  ;;  %v482_v61 = vadd.f32 %v653_v60, %v586_v51 }
 0x1b4   : > { %v473_v62 = vpop.f32.mrf.mxu1 }
 0x1b5   : > { %494 = vst [vmem:[%s218_s26 + $0x30] sm:$0xff] %v482_v61  ;;  %v474_v63 = vadd.f32 %v586_v51, %v473_v62 }
 0x1b6   : > { %v654_v0 = vpop.f32.mrf.mxu1 }
 0x1b7   : > { %492 = vst [vmem:[%s218_s26 + $0x20] sm:$0xff] %v474_v63  ;;  %v485_v1 = vadd.f32 %v654_v0, %v586_v51 }
 0x1b8   : > { %v476_v2 = vpop.f32.mrf.mxu1 }
 0x1b9   : > { %495 = vst [vmem:[%s218_s26 + $0x38] sm:$0xff] %v485_v1  ;;  %v477_v3 = vadd.f32 %v586_v51, %v476_v2 }
 0x1bb   : > { %493 = vst [vmem:[%s218_s26 + $0x28] sm:$0xff] %v477_v3 }
 0x1bc   : > { %719 = shalt.err (!%p716_p3)
}
 0x1bd   : > { %s720_s14 = scalar_lea.hbm %s900_s9, 1024  ;;  %s724_s17 = scalar_lea.hbm %s951_s5, 2048 }
 0x1be   : > { %p721_p4 = scmp.ne.s32.totalorder %s900_s9, %s720_s14  ;;  %p725_p9 = scmp.lt.s32.totalorder %s900_s9, %s951_s5 }
 0x1bf   : > { %p726_p10 = scmp.lt.s32.totalorder %s724_s17, %s720_s14 }
 0x1c0   : > { %p722_p7 = pnand %p721_p4, %p839_p5 }
 0x1c1   : > { %p727_p11 = por %p726_p10, %p725_p9 }
 0x1c2   : > { %p723_p8 = pneg %p722_p7 }
 0x1c4   : > { %p728_p12 = pnand %p727_p11, %p723_p8 }
 0x1c6   : > { %731 = shalt.err (!%p728_p12)
}
 0x1c7   : > { %s769_s26 = smov 128   ;;  %s770_s30 = smov 8  }
 0x1c8   : > { %655 = dma.vmem_to_hbm [thread:$0]  (%p839_p5), %s902_s6, 1024, %s900_s9, %s906_s22, %s769_s26, %s769_s26, %s770_s30  }
 0x1c9 PF: > { %p661_p13 = scmp.ge.s32.totalorder %s766_s21, 2  ;;  %s525_s7 = sand.u32 1, %s754_s18  }
 0x1ca   : > { %s526_s8 = scalar_lea.sflag [#allocation3], %s525_s7 }
 0x1cb   : > { %p658_p0 = pnand %p661_p13, %p843_p6 }
 0x1cd   : > { %p659_p1 = pneg %p658_p0 }
 0x1cf   : > { %749 = dma.done.wait (%p659_p1), %s526_s8, 1024  }
 0x1d0   : > { %751 = vsyncadd (%p659_p1), %s526_s8, 4294966272  ;;  %p15_p2 = scmp.ge.s32.totalorder %s826_s24, 4   ;;  %s954_s18 = smov %s758_s19 }
 0x1d1   : > { %s955_s19 = smov %s762_s20  ;;  %s956_s20 = smov %s837_s27 }
 0x1d2   : > { %s957_s21 = smov %s826_s24  ;;  %17 = sbr.rel (!%p15_p2) target bundleno = 3 (0x3), region = 75 }
 0x1d7   :  { %531 = vsyncpa [#allocation3], 1 }
 0x1d8   :  { %533 = vsyncpa [#allocation3 + $0x1], 1 }

</bundles_post_ra>
